<compile_context>
chip_gen: v7x
topology: tpu7x:2x2x1
jax: 0.10.0
libtpu: 0.0.40
codegen_flags: <defaults>
</compile_context>

<pallas_src>
import jax
import jax.numpy as jnp
from jax.experimental import pallas as pl
from jax.experimental.pallas import tpu as pltpu

LANE = 128  # lane-dense padded class width


# ---------------------------------------------------------------------------
# Fused kernel factory: per-step GCN + ReLU accumulation, MLP head, log_softmax.
# Everything fits VMEM comfortably at these sizes, so a single grid-less
# invocation with whole-array VMEM blocks is used.
# ---------------------------------------------------------------------------
def _make_kernel(T, N, Fin, H, H1, H2, Cp, rows):
    R_GB, R_W1, R_B1, R_W2, R_B2, R_W3, R_B3 = rows

    def kernel(adj_ref, x_ref, gw_ref, p_ref, o_ref):
        # --- per-step GCN: aggregate-first (Â@X)@W, ReLU, summed over T ---
        acc = jnp.zeros((N, H), jnp.float32)
        for t in range(T):  # static unroll, T is tiny
            ax = jnp.dot(adj_ref[t], x_ref[t],
                         preferred_element_type=jnp.float32)          # (N, Fin) f32
            h = jnp.dot(ax.astype(jnp.bfloat16), gw_ref[t],
                        preferred_element_type=jnp.float32)           # (N, H) f32
            h = h + p_ref[R_GB + t:R_GB + t + 1, 0:H]                  # GCN bias row t
            acc = acc + jnp.maximum(h, 0.0)

        # acc is a sum of ReLU outputs -> already non-negative; the module's
        # outer F.relu is an exact identity here, so it is dropped.
        # TODO(synk): nn.Dropout(0.1) treated as inference-mode identity.

        # --- MLP head, weights/biases read from the packed parameter buffer ---
        w1 = p_ref[R_W1:R_W1 + H, 0:H1]
        b1 = p_ref[R_B1:R_B1 + 1, 0:H1]
        w2 = p_ref[R_W2:R_W2 + H1, 0:H2]
        b2 = p_ref[R_B2:R_B2 + 1, 0:H2]
        w3 = p_ref[R_W3:R_W3 + H2, 0:Cp]
        b3 = p_ref[R_B3:R_B3 + 1, 0:Cp]

        z = jnp.maximum(jnp.dot(acc, w1, preferred_element_type=jnp.float32) + b1, 0.0)
        z = jnp.maximum(jnp.dot(z, w2, preferred_element_type=jnp.float32) + b2, 0.0)
        logits = jnp.dot(z, w3, preferred_element_type=jnp.float32) + b3

        # log_softmax over the lane-padded class axis; padded logits sit at
        # ~-1e30 (zero weight cols + -1e30 bias) so exp(.) underflows to 0 and
        # valid classes are unchanged.
        m = jnp.max(logits, axis=-1, keepdims=True)
        s = logits - m
        lse = jnp.log(jnp.sum(jnp.exp(s), axis=-1, keepdims=True))
        o_ref[...] = s - lse

    return kernel


# ---------------------------------------------------------------------------
# Wrapper: host-side parameter packing + grid-less pallas_call.
# ---------------------------------------------------------------------------
def net_forward(x_t, adj_t, gcn_w, gcn_b, w1, b1, w2, b2, w3, b3):
    T, N, Fin = x_t.shape
    H = gcn_w.shape[-1]
    H1 = w1.shape[-1]
    H2 = w2.shape[-1]
    C = w3.shape[-1]
    Cp = LANE

    def r8(n):  # round rows up to a sublane multiple so sections start aligned
        return -(-n // 8) * 8

    R_GB = 0
    R_W1 = R_GB + r8(T)
    R_B1 = R_W1 + r8(H)
    R_W2 = R_B1 + r8(1)
    R_B2 = R_W2 + r8(H1)
    R_W3 = R_B2 + r8(1)
    R_B3 = R_W3 + r8(H2)
    R_TOT = R_B3 + r8(1)

    # Single lane-padded parameter buffer: GCN biases + all MLP weights/biases.
    params = jnp.zeros((R_TOT, Cp), jnp.float32)
    params = params.at[R_GB:R_GB + T, :H].set(gcn_b.reshape(T, H))
    params = params.at[R_W1:R_W1 + H, :H1].set(w1)
    params = params.at[R_B1, :H1].set(b1.reshape(H1))
    params = params.at[R_W2:R_W2 + H1, :H2].set(w2)
    params = params.at[R_B2, :H2].set(b2.reshape(H2))
    # Final layer lane-padded: zero weight cols, -1e30 bias on padded classes
    # (finite in f32; padded logits vanish under softmax; sliced off below).
    params = params.at[R_W3:R_W3 + H2, :C].set(w3)
    params = params.at[R_B3, :].set(jnp.full((Cp,), -1e30, jnp.float32))
    params = params.at[R_B3, :C].set(b3.reshape(C))

    # bf16 operands for the GCN matmuls (f32 accumulation inside the kernel).
    adj_bf = adj_t.astype(jnp.bfloat16)
    x_bf = x_t.astype(jnp.bfloat16)
    gw_bf = gcn_w.astype(jnp.bfloat16)

    kernel = _make_kernel(T, N, Fin, H, H1, H2, Cp,
                          (R_GB, R_W1, R_B1, R_W2, R_B2, R_W3, R_B3))

    flops = (2 * T * N * N * Fin + 2 * T * N * Fin * H
             + 2 * N * (H * H1 + H1 * H2 + H2 * Cp))
    transcendentals = N * Cp + N  # exp + log for the softmax
    bytes_accessed = (adj_bf.size * 2 + x_bf.size * 2 + gw_bf.size * 2
                      + params.size * 4 + N * Cp * 4)

    out_padded = pl.pallas_call(
        kernel,
        out_shape=jax.ShapeDtypeStruct((N, Cp), jnp.float32),
        in_specs=[pl.BlockSpec(memory_space=pltpu.MemorySpace.VMEM)] * 4,
        out_specs=pl.BlockSpec(memory_space=pltpu.MemorySpace.VMEM),
        compiler_params=pltpu.CompilerParams(vmem_limit_bytes=32 * 1024 * 1024),
        cost_estimate=pl.CostEstimate(flops=flops,
                                      transcendentals=transcendentals,
                                      bytes_accessed=bytes_accessed),
    )(adj_bf, x_bf, gw_bf, params)

    return out_padded[:, :C]


# ---------------------------------------------------------------------------
# Glue: dense symmetric-normalized adjacency from an edge_index (GCNConv norm).
# Self-loops are only added where missing (matches add_remaining_self_loops).
# ---------------------------------------------------------------------------
def normalized_adjacency(edge_index, n):
    src, dst = edge_index[0], edge_index[1]
    A = jnp.zeros((n, n), jnp.float32)
    A = A.at[dst, src].add(1.0)
    A = A.at[src, dst].add(1.0)
    A = jnp.minimum(A, 1.0)                                 # dedupe parallel edges
    A = jnp.maximum(A, jnp.eye(n, dtype=jnp.float32))       # add remaining self-loops
    deg = A.sum(axis=1)
    dinv = jnp.where(deg > 0, 1.0 / jnp.sqrt(deg), 0.0)
    return dinv[:, None] * A * dinv[None, :]


def reference_forward(x_t, adj_t, gcn_w, gcn_b, w1, b1, w2, b2, w3, b3):
    h = 0.0
    for t in range(x_t.shape[0]):
        h = h + jnp.maximum(adj_t[t] @ (x_t[t] @ gcn_w[t]) + gcn_b[t], 0.0)
    x = jnp.maximum(h, 0.0)
    x = jnp.maximum(x @ w1 + b1, 0.0)
    x = jnp.maximum(x @ w2 + b2, 0.0)
    x = x @ w3 + b3
    return jax.nn.log_softmax(x, axis=1)


if __name__ == "__main__":
    # Small synthetic sizes consistent with the module:
    T = 3            # T_step == len(data.x)
    N = 32           # nodes per time step
    Fin = 16         # data.num_features
    H = 64           # GCNConv output width
    C = 8            # data.num_classes
    E = 64           # edges per time step

    key = jax.random.PRNGKey(0)
    k_x, k_e, k_gw, k_gb, k1, k2, k3, kb1, kb2, kb3 = jax.random.split(key, 10)

    # Node features per time step and deterministic random graphs.
    x_t = jax.random.normal(k_x, (T, N, Fin), jnp.float32)
    edge_keys = jax.random.split(k_e, T)
    adj_t = jnp.stack([
        normalized_adjacency(
            jax.random.randint(edge_keys[t], (2, E), 0, N), N)
        for t in range(T)
    ])

    # Deterministic parameters (one GCNConv per time step + 3 linear layers).
    scale = 0.1
    gcn_w = scale * jax.random.normal(k_gw, (T, Fin, H), jnp.float32)
    gcn_b = scale * jax.random.normal(k_gb, (T, 1, H), jnp.float32)
    w1 = scale * jax.random.normal(k1, (H, 32), jnp.float32)
    b1 = scale * jax.random.normal(kb1, (1, 32), jnp.float32)
    w2 = scale * jax.random.normal(k2, (32, 16), jnp.float32)
    b2 = scale * jax.random.normal(kb2, (1, 16), jnp.float32)
    w3 = scale * jax.random.normal(k3, (16, C), jnp.float32)
    b3 = scale * jax.random.normal(kb3, (1, C), jnp.float32)

    out = net_forward(x_t, adj_t, gcn_w, gcn_b, w1, b1, w2, b2, w3, b3)
    out = jax.block_until_ready(out)

    ref = reference_forward(x_t, adj_t, gcn_w, gcn_b, w1, b1, w2, b2, w3, b3)
    assert out.shape == (N, C)
    # bf16 GCN operands -> loosened tolerance vs the f32 reference (per review).
    assert jnp.allclose(out, ref, atol=2e-2, rtol=2e-2)

    print("KERNEL_OK")
</pallas_src>

<mosaic_0001>
module attributes {stable_mosaic.version = 11 : i64} {
  func.func @kernel(%arg0: memref<3x32x32xbf16, #tpu.memory_space<vmem>>, %arg1: memref<3x32x16xbf16, #tpu.memory_space<vmem>>, %arg2: memref<3x16x64xbf16, #tpu.memory_space<vmem>>, %arg3: memref<144x128xf32, #tpu.memory_space<vmem>>, %arg4: memref<32x128xf32, #tpu.memory_space<vmem>>) attributes {dimension_semantics = [], scalar_prefetch = 0 : i64, scratch_operands = 0 : i64, tpu.core_type = #tpu.core_type<tc>} {
    %cst = arith.constant 0.000000e+00 : f32
    %0 = vector.broadcast %cst : f32 to vector<32x64xf32>
    %c0 = arith.constant 0 : index
    %c0_0 = arith.constant 0 : index
    %c0_1 = arith.constant 0 : index
    %1 = vector.load %arg0[%c0, %c0_0, %c0_1] : memref<3x32x32xbf16, #tpu.memory_space<vmem>>, vector<1x32x32xbf16>
    %2 = vector.shape_cast %1 : vector<1x32x32xbf16> to vector<32x32xbf16>
    %c0_2 = arith.constant 0 : index
    %c0_3 = arith.constant 0 : index
    %c0_4 = arith.constant 0 : index
    %3 = vector.load %arg1[%c0_2, %c0_3, %c0_4] : memref<3x32x16xbf16, #tpu.memory_space<vmem>>, vector<1x32x16xbf16>
    %4 = vector.shape_cast %3 : vector<1x32x16xbf16> to vector<32x16xbf16>
    %cst_5 = arith.constant dense<0.000000e+00> : vector<32x16xf32>
    %5 = tpu.matmul %2, %4, %cst_5 {dimension_numbers = #tpu.dot_dimension_numbers<[1], [0], [0], [1], [0, 0, 1, 1], [], []>} : vector<32x32xbf16>, vector<32x16xbf16>, vector<32x16xf32> -> vector<32x16xf32>
    %6 = arith.truncf %5 : vector<32x16xf32> to vector<32x16xbf16>
    %c0_6 = arith.constant 0 : index
    %c0_7 = arith.constant 0 : index
    %c0_8 = arith.constant 0 : index
    %7 = vector.load %arg2[%c0_6, %c0_7, %c0_8] : memref<3x16x64xbf16, #tpu.memory_space<vmem>>, vector<1x16x64xbf16>
    %8 = vector.shape_cast %7 : vector<1x16x64xbf16> to vector<16x64xbf16>
    %cst_9 = arith.constant dense<0.000000e+00> : vector<32x64xf32>
    %9 = tpu.matmul %6, %8, %cst_9 {dimension_numbers = #tpu.dot_dimension_numbers<[1], [0], [0], [1], [0, 0, 1, 1], [], []>} : vector<32x16xbf16>, vector<16x64xbf16>, vector<32x64xf32> -> vector<32x64xf32>
    %c0_10 = arith.constant 0 : index
    %c0_11 = arith.constant 0 : index
    %10 = vector.load %arg3[%c0_10, %c0_11] : memref<144x128xf32, #tpu.memory_space<vmem>>, vector<1x64xf32>
    %11 = vector.broadcast %10 : vector<1x64xf32> to vector<32x64xf32>
    %12 = arith.addf %9, %11 : vector<32x64xf32>
    %cst_12 = arith.constant 0.000000e+00 : f32
    %13 = vector.broadcast %cst_12 : f32 to vector<32x64xf32>
    %14 = arith.maximumf %12, %13 : vector<32x64xf32>
    %15 = arith.addf %0, %14 : vector<32x64xf32>
    %c1 = arith.constant 1 : index
    %c0_13 = arith.constant 0 : index
    %c0_14 = arith.constant 0 : index
    %16 = vector.load %arg0[%c1, %c0_13, %c0_14] : memref<3x32x32xbf16, #tpu.memory_space<vmem>>, vector<1x32x32xbf16>
    %17 = vector.shape_cast %16 : vector<1x32x32xbf16> to vector<32x32xbf16>
    %c1_15 = arith.constant 1 : index
    %c0_16 = arith.constant 0 : index
    %c0_17 = arith.constant 0 : index
    %18 = vector.load %arg1[%c1_15, %c0_16, %c0_17] : memref<3x32x16xbf16, #tpu.memory_space<vmem>>, vector<1x32x16xbf16>
    %19 = vector.shape_cast %18 : vector<1x32x16xbf16> to vector<32x16xbf16>
    %cst_18 = arith.constant dense<0.000000e+00> : vector<32x16xf32>
    %20 = tpu.matmul %17, %19, %cst_18 {dimension_numbers = #tpu.dot_dimension_numbers<[1], [0], [0], [1], [0, 0, 1, 1], [], []>} : vector<32x32xbf16>, vector<32x16xbf16>, vector<32x16xf32> -> vector<32x16xf32>
    %21 = arith.truncf %20 : vector<32x16xf32> to vector<32x16xbf16>
    %c1_19 = arith.constant 1 : index
    %c0_20 = arith.constant 0 : index
    %c0_21 = arith.constant 0 : index
    %22 = vector.load %arg2[%c1_19, %c0_20, %c0_21] : memref<3x16x64xbf16, #tpu.memory_space<vmem>>, vector<1x16x64xbf16>
    %23 = vector.shape_cast %22 : vector<1x16x64xbf16> to vector<16x64xbf16>
    %cst_22 = arith.constant dense<0.000000e+00> : vector<32x64xf32>
    %24 = tpu.matmul %21, %23, %cst_22 {dimension_numbers = #tpu.dot_dimension_numbers<[1], [0], [0], [1], [0, 0, 1, 1], [], []>} : vector<32x16xbf16>, vector<16x64xbf16>, vector<32x64xf32> -> vector<32x64xf32>
    %c1_23 = arith.constant 1 : index
    %c0_24 = arith.constant 0 : index
    %25 = vector.load %arg3[%c1_23, %c0_24] : memref<144x128xf32, #tpu.memory_space<vmem>>, vector<1x64xf32>
    %26 = vector.broadcast %25 : vector<1x64xf32> to vector<32x64xf32>
    %27 = arith.addf %24, %26 : vector<32x64xf32>
    %cst_25 = arith.constant 0.000000e+00 : f32
    %28 = vector.broadcast %cst_25 : f32 to vector<32x64xf32>
    %29 = arith.maximumf %27, %28 : vector<32x64xf32>
    %30 = arith.addf %15, %29 : vector<32x64xf32>
    %c2 = arith.constant 2 : index
    %c0_26 = arith.constant 0 : index
    %c0_27 = arith.constant 0 : index
    %31 = vector.load %arg0[%c2, %c0_26, %c0_27] : memref<3x32x32xbf16, #tpu.memory_space<vmem>>, vector<1x32x32xbf16>
    %32 = vector.shape_cast %31 : vector<1x32x32xbf16> to vector<32x32xbf16>
    %c2_28 = arith.constant 2 : index
    %c0_29 = arith.constant 0 : index
    %c0_30 = arith.constant 0 : index
    %33 = vector.load %arg1[%c2_28, %c0_29, %c0_30] : memref<3x32x16xbf16, #tpu.memory_space<vmem>>, vector<1x32x16xbf16>
    %34 = vector.shape_cast %33 : vector<1x32x16xbf16> to vector<32x16xbf16>
    %cst_31 = arith.constant dense<0.000000e+00> : vector<32x16xf32>
    %35 = tpu.matmul %32, %34, %cst_31 {dimension_numbers = #tpu.dot_dimension_numbers<[1], [0], [0], [1], [0, 0, 1, 1], [], []>} : vector<32x32xbf16>, vector<32x16xbf16>, vector<32x16xf32> -> vector<32x16xf32>
    %36 = arith.truncf %35 : vector<32x16xf32> to vector<32x16xbf16>
    %c2_32 = arith.constant 2 : index
    %c0_33 = arith.constant 0 : index
    %c0_34 = arith.constant 0 : index
    %37 = vector.load %arg2[%c2_32, %c0_33, %c0_34] : memref<3x16x64xbf16, #tpu.memory_space<vmem>>, vector<1x16x64xbf16>
    %38 = vector.shape_cast %37 : vector<1x16x64xbf16> to vector<16x64xbf16>
    %cst_35 = arith.constant dense<0.000000e+00> : vector<32x64xf32>
    %39 = tpu.matmul %36, %38, %cst_35 {dimension_numbers = #tpu.dot_dimension_numbers<[1], [0], [0], [1], [0, 0, 1, 1], [], []>} : vector<32x16xbf16>, vector<16x64xbf16>, vector<32x64xf32> -> vector<32x64xf32>
    %c2_36 = arith.constant 2 : index
    %c0_37 = arith.constant 0 : index
    %40 = vector.load %arg3[%c2_36, %c0_37] : memref<144x128xf32, #tpu.memory_space<vmem>>, vector<1x64xf32>
    %41 = vector.broadcast %40 : vector<1x64xf32> to vector<32x64xf32>
    %42 = arith.addf %39, %41 : vector<32x64xf32>
    %cst_38 = arith.constant 0.000000e+00 : f32
    %43 = vector.broadcast %cst_38 : f32 to vector<32x64xf32>
    %44 = arith.maximumf %42, %43 : vector<32x64xf32>
    %45 = arith.addf %30, %44 : vector<32x64xf32>
    %c8 = arith.constant 8 : index
    %c0_39 = arith.constant 0 : index
    %46 = vector.load %arg3[%c8, %c0_39] : memref<144x128xf32, #tpu.memory_space<vmem>>, vector<64x32xf32>
    %c72 = arith.constant 72 : index
    %c0_40 = arith.constant 0 : index
    %47 = vector.load %arg3[%c72, %c0_40] : memref<144x128xf32, #tpu.memory_space<vmem>>, vector<1x32xf32>
    %c80 = arith.constant 80 : index
    %c0_41 = arith.constant 0 : index
    %48 = vector.load %arg3[%c80, %c0_41] : memref<144x128xf32, #tpu.memory_space<vmem>>, vector<32x16xf32>
    %c112 = arith.constant 112 : index
    %c0_42 = arith.constant 0 : index
    %49 = vector.load %arg3[%c112, %c0_42] : memref<144x128xf32, #tpu.memory_space<vmem>>, vector<1x16xf32>
    %c120 = arith.constant 120 : index
    %c0_43 = arith.constant 0 : index
    %50 = vector.load %arg3[%c120, %c0_43] : memref<144x128xf32, #tpu.memory_space<vmem>>, vector<16x128xf32>
    %c136 = arith.constant 136 : index
    %c0_44 = arith.constant 0 : index
    %51 = vector.load %arg3[%c136, %c0_44] : memref<144x128xf32, #tpu.memory_space<vmem>>, vector<1x128xf32>
    %cst_45 = arith.constant dense<0.000000e+00> : vector<32x32xf32>
    %52 = tpu.matmul %45, %46, %cst_45 {dimension_numbers = #tpu.dot_dimension_numbers<[1], [0], [0], [1], [0, 0, 1, 1], [], []>} : vector<32x64xf32>, vector<64x32xf32>, vector<32x32xf32> -> vector<32x32xf32>
    %53 = vector.broadcast %47 : vector<1x32xf32> to vector<32x32xf32>
    %54 = arith.addf %52, %53 : vector<32x32xf32>
    %cst_46 = arith.constant 0.000000e+00 : f32
    %55 = vector.broadcast %cst_46 : f32 to vector<32x32xf32>
    %56 = arith.maximumf %54, %55 : vector<32x32xf32>
    %cst_47 = arith.constant dense<0.000000e+00> : vector<32x16xf32>
    %57 = tpu.matmul %56, %48, %cst_47 {dimension_numbers = #tpu.dot_dimension_numbers<[1], [0], [0], [1], [0, 0, 1, 1], [], []>} : vector<32x32xf32>, vector<32x16xf32>, vector<32x16xf32> -> vector<32x16xf32>
    %58 = vector.broadcast %49 : vector<1x16xf32> to vector<32x16xf32>
    %59 = arith.addf %57, %58 : vector<32x16xf32>
    %cst_48 = arith.constant 0.000000e+00 : f32
    %60 = vector.broadcast %cst_48 : f32 to vector<32x16xf32>
    %61 = arith.maximumf %59, %60 : vector<32x16xf32>
    %cst_49 = arith.constant dense<0.000000e+00> : vector<32x128xf32>
    %62 = tpu.matmul %61, %50, %cst_49 {dimension_numbers = #tpu.dot_dimension_numbers<[1], [0], [0], [1], [0, 0, 1, 1], [], []>} : vector<32x16xf32>, vector<16x128xf32>, vector<32x128xf32> -> vector<32x128xf32>
    %63 = vector.broadcast %51 : vector<1x128xf32> to vector<32x128xf32>
    %64 = arith.addf %62, %63 : vector<32x128xf32>
    %cst_50 = arith.constant dense<0xFF800000> : vector<32xf32>
    %65 = vector.multi_reduction <maximumf>, %64, %cst_50 [1] : vector<32x128xf32> to vector<32xf32>
    %66 = vector.shape_cast %65 : vector<32xf32> to vector<32x1xf32>
    %67 = vector.broadcast %66 : vector<32x1xf32> to vector<32x128xf32>
    %68 = arith.subf %64, %67 : vector<32x128xf32>
    %69 = math.exp %68 : vector<32x128xf32>
    %cst_51 = arith.constant dense<0.000000e+00> : vector<32xf32>
    %70 = vector.multi_reduction <add>, %69, %cst_51 [1] : vector<32x128xf32> to vector<32xf32>
    %71 = vector.shape_cast %70 : vector<32xf32> to vector<32x1xf32>
    %72 = math.log %71 : vector<32x1xf32>
    %73 = vector.broadcast %72 : vector<32x1xf32> to vector<32x128xf32>
    %74 = arith.subf %68, %73 : vector<32x128xf32>
    %c0_52 = arith.constant 0 : index
    %c0_53 = arith.constant 0 : index
    %75 = vector.load %arg4[%c0_52, %c0_53] : memref<32x128xf32, #tpu.memory_space<vmem>>, vector<32x128xf32>
    tpu.vector_store %arg4[%c0_52, %c0_53], %74 {strides = array<i32>} : memref<32x128xf32, #tpu.memory_space<vmem>>, vector<32x128xf32>,
    return
  }
}

</mosaic_0001>

<bundles_post_ra>
// kernel: tpu_custom_call.1
= control target key start
LH: loop header
LB: loop body
LE: loop exit
PB: predicated region body
PF: predicated region fallthrough
CT: control target
= control target key end

     0   :  { %9 = vsyncpa [#allocation3], 0  ;;  %s1355_s0 = inlined_call_operand.vmem [shape: bf16[3,32,32], index: 0, kind: input, shape index: {}]   ;;  %s1356_s1 = inlined_call_operand.vmem [shape: bf16[3,32,16], index: 1, kind: input, shape index: {}]   ;;  %s1357_s2 = inlined_call_operand.vmem [shape: bf16[3,16,64], index: 2, kind: input, shape index: {}]   ;;  %s1358_s3 = inlined_call_operand.hbm [shape: f32[144,128], index: 3, kind: input, shape index: {}]   ;;  %s1359_s4 = inlined_call_operand.hbm [shape: f32[32,128], index: 4, kind: output, shape index: {}]  }
   0x1   :  { %10 = vsyncpa [#allocation4], 0  ;;  %s1231_s15 = smov [#allocation2]   ;;  %s1183_s19 = scalar_lea.hbm %s1358_s3, 2304 }
   0x2   :  { %s22_s16 = sshll.u32 %s1231_s15, 4  ;;  %p1184_p0 = scmp.ne.s32.totalorder %s1358_s3, %s1183_s19  ;;  %s23_s16 = int_to_ptr.vmem [resolvable:$true] %s22_s16 }
   0x3   :  { %p1187_p1 = scmp.lt.u32.totalorder %s1183_s19, %s1358_s3 }
   0x5   :  { %p1189_p2 = pnand %p1187_p1, %p1184_p0 }
   0x7   :  { %1192 = shalt.err (!%p1189_p2)
}
   0x8   :  { %s1193_s24 = scalar_lea.vmem %s23_s16, 2304  ;;  %p1198_p4 = scmp.lt.s32.totalorder %s23_s16, %s23_s16 }
   0x9   :  { %p1194_p3 = scmp.ne.s32.totalorder %s23_s16, %s1193_s24  ;;  %p1199_p5 = scmp.lt.s32.totalorder %s1193_s24, %s1193_s24 }
   0xb   :  { %p1200_p6 = por %p1199_p5, %p1198_p4 }
   0xd   :  { %p1201_p7 = pnand %p1200_p6, %p1194_p3 }
   0xf   :  { %1204 = shalt.err (!%p1201_p7)
}
  0x10   :  { %s1232_s25 = smov 128   ;;  %s1233_s26 = smov 8  }
  0x11   :  { %28 = dma.hbm_to_vmem [thread:$0]  %s1358_s3, 2304, %s23_s16, [#allocation3], %s1232_s25, %s1232_s25, %s1233_s26  }
  0x12   :  { %1227 = dma.done.wait [#allocation3], 2304  }
  0x13   :  { %1228 = vsyncadd [#allocation3], 4294964992  ;;  %v1152_v0 = vld [vmem:[%s1356_s1] sm:$0xff]   ;;  %v1153_v1 = vld [vmem:[%s1356_s1 + $0x8] sm:$0xff]   ;;  %vm63_vm0 = vcmask 261120   ;;  %vm134_vm1 = vcmask 130048  }
  0x14   :  { %1032 = vmatprep.subr.bf16.mxu0 %v1152_v0  ;;  %v1154_v2 = vld [vmem:[%s1355_s0] sm:$0xff]   ;;  %v1155_v3 = vld [vmem:[%s1355_s0 + $0x8] sm:$0xff]   ;;  %v1157_v5 = vld [vmem:[%s1356_s1 + $0x10] sm:$0xff]   ;;  %vm551_vm2 = vcmask 523264  }
  0x15   :  { %1033 = vmatpush3.bf16.msra.mxu0 %v1152_v0  ;;  %1036 = vmatprep.mubr.msk.bf16.mxu0 %vm63_vm0, %v1154_v2  ;;  %v1156_v4 = vld [vmem:[%s1357_s2] sm:$0xff]   ;;  %v1159_v12 = vld [vmem:[%s1355_s0 + $0x10] sm:$0xff]   ;;  %v1158_v13 = vld [vmem:[%s1356_s1 + $0x18] sm:$0xff]  }
  0x16   :  { %1034 = vmatprep.subr.bf16.mxu0 %v1153_v1  ;;  %1040 = vmatprep.subr.bf16.mxu1 %v1156_v4  ;;  %v1160_v14 = vld [vmem:[%s1356_s1 + $0x20] sm:$0xff]   ;;  %v1161_v15 = vld [vmem:[%s1355_s0 + $0x18] sm:$0xff]   ;;  %v1162_v17 = vld [vmem:[%s1356_s1 + $0x28] sm:$0xff]  }
  0x17   :  { %1041 = vmatpush3.bf16.msra.mxu1 %v1156_v4  ;;  %v1163_v16 = vld [vmem:[%s1355_s0 + $0x20] sm:$0xff]   ;;  %v1164_v18 = vld [vmem:[%s1355_s0 + $0x28] sm:$0xff]   ;;  %v1166_v20 = vld [vmem:[%s1357_s2 + $0x10] sm:$0xff]   ;;  %s1234_s0 = smov [#allocation5]  }
  0x18   :  { %1046 = vmatprep.subr.bf16.mxu1 %v1157_v5  ;;  %v1165_v19 = vld [vmem:[%s1357_s2 + $0x8] sm:$0xff]   ;;  %v531_v38 = vld [vmem:[#allocation2 + $0x10] sm:$0xff]  ;;  %v532_v40 = vld [vmem:[#allocation2 + $0x18] sm:$0xff]  ;;  %s908_s2 = sshll.u32 %s1234_s0, 4  ;;  %s909_s2 = int_to_ptr.vmem [resolvable:$true] %s908_s2 }
  0x19   :  { %1035 = vmatpush3.bf16.msra.mxu0 %v1153_v1  ;;  %v530_v37 = vld [vmem:[#allocation2 + $0x8] sm:$0xff]  ;;  %v533_v41 = vld [vmem:[#allocation2 + $0x20] sm:$0xff]  ;;  %v535_v44 = vld [vmem:[#allocation2 + $0x30] sm:$0xff]  ;;  %s1205_s7 = scalar_lea.vmem %s909_s2, 512  ;;  %p1210_p9 = scmp.lt.s32.totalorder %s909_s2, %s909_s2 }
  0x1a   :  { %1054 = vmatprep.subr.bf16.mxu0 %v1165_v19  ;;  %v1120_v39 = vpack.c.bf16 %v531_v38, %v530_v37  ;;  %v1124_v42 = vpack.c.bf16 %v533_v41, %v532_v40  ;;  %v534_v43 = vld [vmem:[#allocation2 + $0x28] sm:$0xff]  ;;  %v536_v46 = vld [vmem:[#allocation2 + $0x38] sm:$0xff]  ;;  %v537_v47 = vld [vmem:[#allocation2 + $0x40] sm:$0xff]  ;;  %p1206_p8 = scmp.ne.s32.totalorder %s909_s2, %s1205_s7  ;;  %p1211_p10 = scmp.lt.s32.totalorder %s1205_s7, %s1205_s7 }
  0x1b   :  { %v1128_v45 = vpack.c.bf16 %v535_v44, %v534_v43  ;;  %v1132_v48 = vpack.c.bf16 %v537_v47, %v536_v46  ;;  %v539_v49 = vld [vmem:[#allocation2 + $0x50] sm:$0xff]  ;;  %v540_v50 = vld [vmem:[#allocation2 + $0x58] sm:$0xff]  ;;  %v926_v52 = vld [vmem:[#allocation2] ss:$0 sm:$0xff] }
  0x1c   :  { %1037 = vmatmul.mubr.msk.bf16.vlgmr.msra.gmra.mrb[0].mxu0 %vm63_vm0, %v1155_v3  ;;  %v1136_v51 = vpack.c.bf16 %v540_v50, %v539_v49  ;;  %v946_v53 = vld [vmem:[#allocation2 + $0x1] ss:$0 sm:$0xff]  ;;  %v970_v37 = vld [vmem:[#allocation2 + $0x48] ss:$0 sm:$0xff]  ;;  %v975_v50 = vld [vmem:[#allocation2 + $0x70] ss:$0 sm:$0xff]  ;;  %p1212_p11 = por %p1211_p10, %p1210_p9 }
  0x1d   :  { %1055 = vmatpush3.bf16.msra.mxu0 %v1165_v19 }
  0x1e   :  { %1068 = vmatprep.subr.bf16.mxu0 %v1166_v20  ;;  %p1213_p12 = pnand %p1212_p11, %p1206_p8 }
  0xef   :  { %v1038_v6 = vpop.f32.mrb[0].mxu0 }
  0xf0   :  { %v104_v7 = vpop.f32.mrb[1].mxu0 }
  0xf1   :  { %v1039_v8 = vpop.f32.mrb[2].mxu0 }
  0xf2   :  { %v120_v9 = vpack.c.bf16 %v1039_v8, %v1038_v6  ;;  %v107_v10 = vpop.f32.mrb[3].mxu0 }
  0xf3   :  { %v119_v11 = vpack.c.bf16 %v107_v10, %v104_v7 }
  0xf5   :  { %1042 = vmatprep.mubr.msk.bf16.mxu1 %vm134_vm1, %v119_v11 }
  0xf6   :  { %1043 = vmatmul.mubr.msk.bf16.vlgmr.msra.gmra.mrb[0].mxu1 %vm134_vm1, %v120_v9 }
  0xf7   :  { %1047 = vmatpush3.bf16.msra.mxu1 %v1157_v5  ;;  %1050 = vmatprep.mubr.msk.bf16.mxu1 %vm63_vm0, %v1159_v12  ;;  %v966_v12 = vld [vmem:[#allocation2 + $0x2] ss:$0 sm:$0xff] }
  0xf8   :  { %1048 = vmatprep.subr.bf16.mxu1 %v1158_v13 }
  0xfb   :  { %1049 = vmatpush3.bf16.msra.mxu1 %v1158_v13 }
  0xfc   :  { %1060 = vmatprep.subr.bf16.mxu1 %v1160_v14 }
  0xfe   :  { %1051 = vmatmul.mubr.msk.bf16.vlgmr.msra.gmra.mrb[4].mxu1 %vm63_vm0, %v1161_v15 }
  0xff   :  { %1061 = vmatpush3.bf16.msra.mxu1 %v1160_v14  ;;  %1064 = vmatprep.mubr.msk.bf16.mxu1 %vm63_vm0, %v1163_v16 }
 0x100   :  { %1062 = vmatprep.subr.bf16.mxu1 %v1162_v17 }
 0x103   :  { %1063 = vmatpush3.bf16.msra.mxu1 %v1162_v17 }
 0x104   :  { %1121 = vmatprep.subr.bf16.mxu1 %v1120_v39 }
 0x106   :  { %1065 = vmatmul.mubr.msk.bf16.vlgmr.msra.gmra.mrb[8].mxu1 %vm63_vm0, %v1164_v18 }
 0x107   :  { %1123 = vmatpush3.bf16.msra.mxu1 %v1120_v39 }
 0x108   :  { %1125 = vmatprep.subr.bf16.mxu1 %v1124_v42 }
 0x10b   :  { %1127 = vmatpush3.bf16.msra.mxu1 %v1124_v42 }
 0x10c   :  { %1129 = vmatprep.subr.bf16.mxu1 %v1128_v45 }
 0x10f   :  { %1131 = vmatpush3.bf16.msra.mxu1 %v1128_v45 }
 0x110   :  { %1133 = vmatprep.subr.bf16.mxu1 %v1132_v48 }
 0x113   :  { %1135 = vmatpush3.bf16.msra.mxu1 %v1132_v48 }
 0x1c9   :  { %v1044_v21 = vpop.f32.mrb[0].mxu1 }
 0x1ca   :  { %v175_v22 = vpop.f32.mrb[1].mxu1  ;;  %v184_v54 = vadd.f32 %v1044_v21, %v926_v52 }
 0x1cb   :  { %v1045_v23 = vpop.f32.mrb[2].mxu1  ;;  %v176_v55 = vadd.f32 %v926_v52, %v175_v22 }
 0x1cc   :  { %v178_v24 = vpop.f32.mrb[3].mxu1  ;;  %v187_v57 = vadd.f32 %v1045_v23, %v926_v52  ;;  %v192_v63 = vmax.f32 %v184_v54, 0.0 }
 0x1cd   :  { %v179_v60 = vadd.f32 %v926_v52, %v178_v24  ;;  %v190_v3 = vmax.f32 %v176_v55, 0.0 }
 0x1ce   :  { %v193_v6 = vmax.f32 %v187_v57, 0.0 }
 0x1cf   :  { %v191_v9 = vmax.f32 %v179_v60, 0.0 }
 0x1d1   :  { %v1052_v25 = vpop.f32.mrb[4].mxu1 }
 0x1d2   :  { %v270_v26 = vpop.f32.mrb[5].mxu1 }
 0x1d3   :  { %v1053_v27 = vpop.f32.mrb[6].mxu1 }
 0x1d4   :  { %v286_v28 = vpack.c.bf16 %v1053_v27, %v1052_v25  ;;  %v273_v29 = vpop.f32.mrb[7].mxu1 }
 0x1d5   :  { %v285_v30 = vpack.c.bf16 %v273_v29, %v270_v26 }
 0x1d7   :  { %1056 = vmatprep.mubr.msk.bf16.mxu0 %vm134_vm1, %v285_v30 }
 0x1d8   :  { %1057 = vmatmul.mubr.msk.bf16.vlgmr.msra.gmra.mrb[4].mxu0 %vm134_vm1, %v286_v28 }
 0x1d9   :  { %1069 = vmatpush3.bf16.msra.mxu0 %v1166_v20  ;;  %v1066_v31 = vpop.f32.mrb[8].mxu1 }
 0x1da   :  { %v436_v32 = vpop.f32.mrb[9].mxu1  ;;  %1137 = vmatprep.subr.bf16.mxu0 %v1136_v51 }
 0x1db   :  { %v1067_v33 = vpop.f32.mrb[10].mxu1 }
 0x1dc   :  { %v452_v34 = vpack.c.bf16 %v1067_v33, %v1066_v31  ;;  %v439_v35 = vpop.f32.mrb[11].mxu1  ;;  %v541_v31 = vld [vmem:[#allocation2 + $0x60] sm:$0xff] }
 0x1dd   :  { %v451_v36 = vpack.c.bf16 %v439_v35, %v436_v32  ;;  %v542_v32 = vld [vmem:[#allocation2 + $0x68] sm:$0xff]  ;;  %v545_v35 = vld [vmem:[#allocation2 + $0x80] sm:$0xff] }
 0x1de   :  { %v1140_v33 = vpack.c.bf16 %v542_v32, %v541_v31 }
 0x1df   :  { %1070 = vmatprep.mubr.msk.bf16.mxu0 %vm134_vm1, %v451_v36 }
 0x1e0   :  { %1071 = vmatmul.mubr.msk.bf16.vlgmr.msra.gmra.mrb[8].mxu0 %vm134_vm1, %v452_v34  ;;  %v544_v34 = vld [vmem:[#allocation2 + $0x78] sm:$0xff] }
 0x1e1   :  { %1139 = vmatpush3.bf16.msra.mxu0 %v1136_v51  ;;  %v1144_v36 = vpack.c.bf16 %v545_v35, %v544_v34 }
 0x1e2   :  { %1141 = vmatprep.subr.bf16.mxu0 %v1140_v33 }
 0x1e5   :  { %1143 = vmatpush3.bf16.msra.mxu0 %v1140_v33 }
 0x1e6   :  { %1145 = vmatprep.subr.bf16.mxu0 %v1144_v36 }
 0x2ab   :  { %v1058_v56 = vpop.f32.mrb[4].mxu0 }
 0x2ac   :  { %v350_v58 = vadd.f32 %v1058_v56, %v946_v53  ;;  %v341_v59 = vpop.f32.mrb[5].mxu0 }
 0x2ad   :  { %v342_v61 = vadd.f32 %v946_v53, %v341_v59  ;;  %v1059_v62 = vpop.f32.mrb[6].mxu0 }
 0x2ae   :  { %v358_v0 = vmax.f32 %v350_v58, 0.0  ;;  %v353_v1 = vadd.f32 %v1059_v62, %v946_v53  ;;  %v344_v2 = vpop.f32.mrb[7].mxu0 }
 0x2af   :  { %v356_v4 = vmax.f32 %v342_v61, 0.0  ;;  %v345_v5 = vadd.f32 %v946_v53, %v344_v2 }
 0x2b0   :  { %v362_v7 = vadd.f32 %v358_v0, %v192_v63  ;;  %v359_v8 = vmax.f32 %v353_v1, 0.0  ;;  %v980_v63 = vld [vmem:[#allocation2 + $0x88] ss:$0 sm:$0xff] }
 0x2b1   :  { %v360_v10 = vadd.f32 %v356_v4, %v190_v3  ;;  %v357_v11 = vmax.f32 %v345_v5, 0.0 }
 0x2b2   :  { %v363_v13 = vadd.f32 %v359_v8, %v193_v6 }
 0x2b3   :  { %v361_v14 = vadd.f32 %v357_v11, %v191_v9  ;;  %v1072_v15 = vpop.f32.mrb[8].mxu0 }
 0x2b4   :  { %v516_v16 = vadd.f32 %v1072_v15, %v966_v12  ;;  %v507_v17 = vpop.f32.mrb[9].mxu0 }
 0x2b5   :  { %v508_v18 = vadd.f32 %v966_v12, %v507_v17  ;;  %v1073_v19 = vpop.f32.mrb[10].mxu0 }
 0x2b6   :  { %v524_v20 = vmax.f32 %v516_v16, 0.0  ;;  %v519_v21 = vadd.f32 %v1073_v19, %v966_v12  ;;  %v510_v22 = vpop.f32.mrb[11].mxu0 }
 0x2b7   :  { %v522_v23 = vmax.f32 %v508_v18, 0.0  ;;  %v511_v24 = vadd.f32 %v966_v12, %v510_v22 }
 0x2b8   :  { %v528_v25 = vadd.f32 %v524_v20, %v362_v7  ;;  %v525_v26 = vmax.f32 %v519_v21, 0.0 }
 0x2b9   :  { %v526_v27 = vadd.f32 %v522_v23, %v360_v10  ;;  %v523_v28 = vmax.f32 %v511_v24, 0.0 }
 0x2ba   :  { %v529_v29 = vadd.f32 %v525_v26, %v363_v13 }
 0x2bb   :  { %v527_v30 = vadd.f32 %v523_v28, %v361_v14  ;;  %1090 = vmatprep.mubr.msk.f32.mxu1 %vm551_vm2, %v526_v27 }
 0x2bd   :  { %1091 = vmatmul.mubr.msk.f32.vlgmr.msra.gmra.mrb[12].mxu1 %vm551_vm2, %v527_v30 }
 0x2be   :  { %1093 = vmatprep.mubr.msk.f32.mxu1 %vm551_vm2, %v528_v25 }
 0x2c1   :  { %1094 = vmatmul.mubr.msk.f32.gmra.mrb[14].mxu1 %vm551_vm2, %v529_v29 }
 0x390   :  { %v1092_v38 = vpop.f32.mrb[12].mxu1 }
 0x391   :  { %v636_v39 = vadd.f32 %v1092_v38, %v970_v37  ;;  %v630_v40 = vpop.f32.mrb[13].mxu1 }
 0x392   :  { %v631_v41 = vadd.f32 %v970_v37, %v630_v40 }
 0x393   :  { %v650_v44 = vmax.f32 %v636_v39, 0.0 }
 0x394   :  { %v649_v42 = vmax.f32 %v631_v41, 0.0  ;;  %v1095_v43 = vpop.f32.mrb[14].mxu1 }
 0x395   :  { %v646_v45 = vadd.f32 %v1095_v43, %v970_v37  ;;  %v640_v46 = vpop.f32.mrb[15].mxu1 }
 0x396   :  { %v641_v47 = vadd.f32 %v970_v37, %v640_v46  ;;  %1104 = vmatprep.mubr.msk.f32.mxu0 %vm63_vm0, %v649_v42 }
 0x397   :  { %1105 = vmatmul.mubr.msk.f32.vlgmr.msra.gmra.mrb[12].mxu0 %vm63_vm0, %v650_v44  ;;  %v652_v49 = vmax.f32 %v646_v45, 0.0 }
 0x398   :  { %v651_v48 = vmax.f32 %v641_v47, 0.0  ;;  %1147 = vmatpush3.bf16.msra.mxu0 %v1144_v36 }
 0x39a   :  { %1107 = vmatprep.mubr.msk.f32.mxu0 %vm63_vm0, %v651_v48 }
 0x39b   :  { %1108 = vmatmul.mubr.msk.f32.gmra.mrb[14].mxu0 %vm63_vm0, %v652_v49 }
 0x46a   :  { %v1106_v51 = vpop.f32.mrb[12].mxu0 }
 0x46b   :  { %v741_v52 = vadd.f32 %v1106_v51, %v975_v50  ;;  %v735_v53 = vpop.f32.mrb[13].mxu0 }
 0x46c   :  { %v736_v54 = vadd.f32 %v975_v50, %v735_v53 }
 0x46d   :  { %v755_v57 = vmax.f32 %v741_v52, 0.0 }
 0x46e   :  { %v754_v55 = vmax.f32 %v736_v54, 0.0  ;;  %v1109_v56 = vpop.f32.mrb[14].mxu0 }
 0x46f   :  { %v751_v58 = vadd.f32 %v1109_v56, %v975_v50  ;;  %v745_v59 = vpop.f32.mrb[15].mxu0 }
 0x470   :  { %v746_v60 = vadd.f32 %v975_v50, %v745_v59  ;;  %1114 = vmatprep.mubr.msk.f32.mxu0 %vm134_vm1, %v754_v55 }
 0x471   :  { %1115 = vmatmul.mubr.msk.f32.vlgmr.msra.gmra.mrb[16].mxu0 %vm134_vm1, %v755_v57  ;;  %v757_v62 = vmax.f32 %v751_v58, 0.0 }
 0x472   :  { %v756_v61 = vmax.f32 %v746_v60, 0.0 }
 0x474   :  { %1117 = vmatprep.mubr.msk.f32.mxu0 %vm134_vm1, %v756_v61 }
 0x475   :  { %1118 = vmatmul.mubr.msk.f32.gmra.mrb[18].mxu0 %vm134_vm1, %v757_v62 }
 0x544   :  { %v1116_v0 = vpop.f32.mrb[16].mxu0 }
 0x545   :  { %v840_v1 = vpop.f32.mrb[17].mxu0  ;;  %v846_v5 = vadd.f32 %v1116_v0, %v980_v63 }
 0x546   :  { %v841_v2 = vadd.f32 %v980_v63, %v840_v1 }
 0x548   :  { %v1119_v3 = vpop.f32.mrb[18].mxu0  ;;  %859 = vmax.xlane.f32.xlu0 %v841_v2 }
 0x549   :  { %v850_v4 = vpop.f32.mrb[19].mxu0  ;;  %v856_v7 = vadd.f32 %v1119_v3, %v980_v63 }
 0x54a   :  { %v851_v6 = vadd.f32 %v980_v63, %v850_v4 }
 0x54c   :  { %863 = vmax.xlane.f32.xlu1 %v851_v6  ;;  %861 = vmax.xlane.f32.xlu0 %v846_v5 }
 0x550   :  { %865 = vmax.xlane.f32.xlu1 %v856_v7 }
 0x5d5   :  { %v860_v8 = vpop.xlane.xlu0 %859 }
 0x5d6   :  { %v867_v9 = vsub.f32 %v841_v2, %v860_v8 }
 0x5d8   :  { %v871_v10 = vmul.f32 1.442695, %v867_v9 }
 0x5d9   :  { %v864_v11 = vpop.xlane.xlu1 %863  ;;  %v862_v12 = vpop.xlane.xlu0 %861 }
 0x5da   :  { %1167 = vpow2.f32 %v871_v10  ;;  %v869_v13 = vsub.f32 %v851_v6, %v864_v11  ;;  %v868_v14 = vsub.f32 %v846_v5, %v862_v12 }
 0x5dc   :  { %v875_v15 = vmul.f32 1.442695, %v869_v13  ;;  %v873_v16 = vmul.f32 1.442695, %v868_v14 }
 0x5dd   :  { %v866_v17 = vpop.xlane.xlu1 %865 }
 0x5de   :  { %1169 = vpow2.f32 %v875_v15  ;;  %v870_v18 = vsub.f32 %v856_v7, %v866_v17 }
 0x5df   :  { %1171 = vpow2.f32 %v873_v16 }
 0x5e0   :  { %v877_v19 = vmul.f32 1.442695, %v870_v18 }
 0x5e2   :  { %1173 = vpow2.f32 %v877_v19 }
 0x5e4   :  { %v1168_v20 = vpop.eup %1167 }
 0x5e5   :  { %879 = vadd.xlane.f32.xlu0 %v1168_v20 }
 0x5e8   :  { %v1170_v21 = vpop.eup %1169 }
 0x5e9   :  { %v1172_v22 = vpop.eup %1171  ;;  %883 = vadd.xlane.f32.xlu0 %v1170_v21 }
 0x5ea   :  { %881 = vadd.xlane.f32.xlu1 %v1172_v22 }
 0x5ec   :  { %v1174_v23 = vpop.eup %1173 }
 0x5ee   :  { %885 = vadd.xlane.f32.xlu1 %v1174_v23 }
 0x672   :  { %v880_v24 = vpop.xlane.xlu0 %879 }
 0x673   :  { %1175 = vlog2.f32 %v880_v24 }
 0x676   :  { %v884_v25 = vpop.xlane.xlu0 %883 }
 0x677   :  { %v882_v26 = vpop.xlane.xlu1 %881  ;;  %1177 = vlog2.f32 %v884_v25 }
 0x678   :  { %1179 = vlog2.f32 %v882_v26 }
 0x67b   :  { %v886_v27 = vpop.xlane.xlu1 %885 }
 0x67c   :  { %1181 = vlog2.f32 %v886_v27 }
 0x67d   :  { %v1176_v28 = vpop.eup %1175 }
 0x67e   :  { %v888_v29 = vmul.f32 0.6931472, %v1176_v28 }
 0x680   :  { %v895_v30 = vsub.f32 %v867_v9, %v888_v29 }
 0x681   :  { %v1178_v31 = vpop.eup %1177 }
 0x682   :  { %v1180_v32 = vpop.eup %1179  ;;  %899 = vst [vmem:[#allocation5] sm:$0xff] %v895_v30  ;;  %v892_v33 = vmul.f32 0.6931472, %v1178_v31 }
 0x683   :  { %v890_v34 = vmul.f32 0.6931472, %v1180_v32 }
 0x684   :  { %v897_v35 = vsub.f32 %v869_v13, %v892_v33 }
 0x685   :  { %v896_v36 = vsub.f32 %v868_v14, %v890_v34 }
 0x686   :  { %v1182_v37 = vpop.eup %1181  ;;  %901 = vst [vmem:[#allocation5 + $0x10] sm:$0xff] %v897_v35 }
 0x687   :  { %900 = vst [vmem:[#allocation5 + $0x8] sm:$0xff] %v896_v36  ;;  %v894_v38 = vmul.f32 0.6931472, %v1182_v37 }
 0x689   :  { %v898_v39 = vsub.f32 %v870_v18, %v894_v38 }
 0x68b   :  { %902 = vst [vmem:[#allocation5 + $0x18] sm:$0xff] %v898_v39 }
 0x68c   :  { %1216 = shalt.err (!%p1213_p12)
}
 0x68d   :  { %s1217_s9 = scalar_lea.hbm %s1359_s4, 512 }
 0x68e   :  { %p1218_p13 = scmp.ne.s32.totalorder %s1359_s4, %s1217_s9  ;;  %p1221_p0 = scmp.lt.u32.totalorder %s1217_s9, %s1359_s4 }
 0x690   :  { %p1223_p1 = pnand %p1221_p0, %p1218_p13 }
 0x692   :  { %1226 = shalt.err (!%p1223_p1)
}
 0x693   :  { %914 = dma.vmem_to_hbm [thread:$0]  %s909_s2, 512, %s1359_s4, [#allocation4], %s1232_s25, %s1232_s25, %s1233_s26  }
 0x694   :  { %1229 = dma.done.wait [#allocation4], 512  }
 0x695   :  { %1230 = vsyncadd [#allocation4], 4294966784 }
 0x696   :  { %918 = vsyncpa [#allocation3], 1 }
 0x697   :  { %919 = vsyncpa [#allocation4], 1 }

</bundles_post_ra>
